<compile_context>
chip_gen: v7x
topology: tpu7x:2x2x1
jax: 0.10.0
libtpu: 0.0.40
codegen_flags: <defaults>
</compile_context>

<pallas_src>
import jax
import jax.numpy as jnp
import numpy as np
from jax.experimental import pallas as pl
from jax.experimental.pallas import tpu as pltpu

Cin, Cout, KH, KW = 32, 64, 3, 3
STRIDE = 2
EPS = 1e-5          # nn.BatchNorm2d default
NEG_SLOPE = 0.2     # LeakyReLU slope

K_MAIN = 8 * Cin    # 256 = 2 x 128 lanes: first 8 taps
K_TAIL = Cin        # 32: ninth tap


def conv_stats_kernel(p0_ref, p1_ref, w0_ref, w1_ref,
                      y_ref, sum_ref, sumsq_ref,
                      acc_sum, acc_sumsq):
    """Pass 1: conv matmul for one M-tile + per-channel sum/sumsq accumulation."""
    i = pl.program_id(0)

    # Conv for this tile. Bias is intentionally omitted: train-mode BN cancels it exactly.
    conv = jnp.dot(p0_ref[...], w0_ref[...], preferred_element_type=jnp.float32)
    conv = conv + jnp.dot(p1_ref[...], w1_ref[...], preferred_element_type=jnp.float32)
    y_ref[...] = conv

    @pl.when(i == 0)
    def _():
        acc_sum[...] = jnp.zeros_like(acc_sum)
        acc_sumsq[...] = jnp.zeros_like(acc_sumsq)

    acc_sum[...] += jnp.sum(conv, axis=0, keepdims=True)
    acc_sumsq[...] += jnp.sum(conv * conv, axis=0, keepdims=True)

    @pl.when(i == pl.num_programs(0) - 1)
    def _():
        sum_ref[...] = acc_sum[...]
        sumsq_ref[...] = acc_sumsq[...]


def bn_lrelu_kernel(y_ref, scale_ref, offset_ref, o_ref):
    """Pass 2: folded BN affine + LeakyReLU over a lane-dense (TB, 512) tile."""
    y = y_ref[...] * scale_ref[...] + offset_ref[...]
    o_ref[...] = jnp.where(y > 0, y, NEG_SLOPE * y)


def group3_forward(x, weight, bias, gamma, beta, *, tm=512):
    """x: (N, Cin, H, W) NCHW; weight: (Cout, Cin, KH, KW) (PyTorch Conv2d layout)."""
    del bias  # exactly cancelled by train-mode BatchNorm; see kernel comment.
    N, _, H, W = x.shape

    # TF-style SAME padding used by the file's custom Conv2d.
    OH = -(-H // STRIDE)
    OW = -(-W // STRIDE)
    ph = max(0, (OH - 1) * STRIDE + KH - H)
    pw = max(0, (OW - 1) * STRIDE + KW - W)

    x_nhwc = jnp.transpose(x, (0, 2, 3, 1))                       # (N, H, W, Cin)
    xpad = jnp.pad(x_nhwc, ((0, 0), (ph // 2, ph - ph // 2),
                            (pw // 2, pw - pw // 2), (0, 0)))

    # Wrapper-side tap slices (cheap XLA glue): 9 strided views, grouped so the Pallas contraction
    # chunks are 128-lane aligned (no zero-padded K, no masked lanes on the dominant operand).
    taps = [xpad[:, kh:kh + (OH - 1) * STRIDE + 1:STRIDE,
                 kw:kw + (OW - 1) * STRIDE + 1:STRIDE, :]          # (N, OH, OW, Cin)
            for kh in range(KH) for kw in range(KW)]
    M = N * OH * OW
    p0 = jnp.concatenate(taps[:8], axis=-1).reshape(M, K_MAIN)
    p1 = taps[8].reshape(M, K_TAIL)

    TM = int(tm)
    assert TM % 64 == 0
    Mp = ((M + TM - 1) // TM) * TM
    if Mp != M:
        # Zero rows are harmless: conv(0) = 0 (no bias), so accumulated BN stats are unaffected.
        p0 = jnp.pad(p0, ((0, Mp - M), (0, 0)))
        p1 = jnp.pad(p1, ((0, Mp - M), (0, 0)))

    # (Cout, Cin, KH, KW) -> (KH*KW*Cin, Cout), rows ordered (kh, kw, ci) to match the taps.
    wmat = jnp.transpose(weight, (2, 3, 1, 0)).reshape(KH * KW * Cin, Cout)
    w0, w1 = wmat[:K_MAIN], wmat[K_MAIN:]

    # ---------------- pass 1: conv + batch-stat accumulation (M axis is a reduction) -------------
    conv_out, csum, csumsq = pl.pallas_call(
        conv_stats_kernel,
        out_shape=(jax.ShapeDtypeStruct((Mp, Cout), jnp.float32),
                   jax.ShapeDtypeStruct((1, Cout), jnp.float32),
                   jax.ShapeDtypeStruct((1, Cout), jnp.float32)),
        grid_spec=pltpu.PrefetchScalarGridSpec(
            num_scalar_prefetch=0,
            grid=(Mp // TM,),
            in_specs=[
                pl.BlockSpec((TM, K_MAIN), lambda i: (i, 0)),
                pl.BlockSpec((TM, K_TAIL), lambda i: (i, 0)),
                pl.BlockSpec((K_MAIN, Cout), lambda i: (0, 0)),   # resident weights
                pl.BlockSpec((K_TAIL, Cout), lambda i: (0, 0)),
            ],
            out_specs=[
                pl.BlockSpec((TM, Cout), lambda i: (i, 0)),
                pl.BlockSpec((1, Cout), lambda i: (0, 0)),
                pl.BlockSpec((1, Cout), lambda i: (0, 0)),
            ],
            scratch_shapes=[pltpu.VMEM((1, Cout), jnp.float32),
                            pltpu.VMEM((1, Cout), jnp.float32)],
        ),
        compiler_params=pltpu.CompilerParams(
            dimension_semantics=("arbitrary",)),      # stats accumulate across M tiles
    )(p0, p1, w0, w1)

    # ------------- fold BN (train-mode batch stats) into one per-channel scale/offset ------------
    mean = csum[0] / M
    var = jnp.maximum(csumsq[0] / M - mean * mean, 0.0)   # clamp E[x^2]-E[x]^2 cancellation
    scale = gamma * jax.lax.rsqrt(var + EPS)
    offset = beta - mean * scale

    # ---------------- pass 2: lane-dense normalize + LeakyReLU (parallel M axis) -----------------
    LANES = 8 * Cout                       # 512 lanes: same row-major memory as (Mp, Cout)
    rows = Mp // 8
    TB = TM // 8
    y2 = conv_out.reshape(rows, LANES)
    scale_t = jnp.tile(scale, LANES // Cout).reshape(1, LANES)
    offset_t = jnp.tile(offset, LANES // Cout).reshape(1, LANES)

    out2 = pl.pallas_call(
        bn_lrelu_kernel,
        out_shape=jax.ShapeDtypeStruct((rows, LANES), jnp.float32),
        grid_spec=pltpu.PrefetchScalarGridSpec(
            num_scalar_prefetch=0,
            grid=(rows // TB,),
            in_specs=[
                pl.BlockSpec((TB, LANES), lambda i: (i, 0)),
                pl.BlockSpec((1, LANES), lambda i: (0, 0)),
                pl.BlockSpec((1, LANES), lambda i: (0, 0)),
            ],
            out_specs=pl.BlockSpec((TB, LANES), lambda i: (i, 0)),
        ),
        compiler_params=pltpu.CompilerParams(
            dimension_semantics=("parallel",)),
    )(y2, scale_t, offset_t)

    out = out2.reshape(Mp, Cout)[:M].reshape(N, OH, OW, Cout)
    return jnp.transpose(out, (0, 3, 1, 2))               # back to NCHW


def reference(x, weight, bias, gamma, beta):
    """Pure-JAX reference matching the PyTorch forward (SAME-pad conv + bias, train-mode BN, LeakyReLU)."""
    N, _, H, W = x.shape
    OH = -(-H // STRIDE)
    OW = -(-W // STRIDE)
    ph = max(0, (OH - 1) * STRIDE + KH - H)
    pw = max(0, (OW - 1) * STRIDE + KW - W)
    y = jax.lax.conv_general_dilated(
        x, weight, window_strides=(STRIDE, STRIDE),
        padding=((ph // 2, ph - ph // 2), (pw // 2, pw - pw // 2)),
        dimension_numbers=('NCHW', 'OIHW', 'NCHW'))
    y = y + bias.reshape(1, Cout, 1, 1)
    mean = y.mean(axis=(0, 2, 3), keepdims=True)
    var = y.var(axis=(0, 2, 3), keepdims=True)            # biased, as PyTorch normalizes with
    y = (y - mean) / jnp.sqrt(var + EPS) * gamma.reshape(1, Cout, 1, 1) + beta.reshape(1, Cout, 1, 1)
    return jnp.where(y > 0, y, NEG_SLOPE * y)


if __name__ == "__main__":
    key = jax.random.PRNGKey(0)
    kx, kw, kb, kg, kbt = jax.random.split(key, 5)

    N, H, W = 2, 16, 16                                   # output is (2, 64, 8, 8)
    x = jax.random.normal(kx, (N, Cin, H, W), jnp.float32)

    fan_in = Cin * KH * KW
    bound = 1.0 / np.sqrt(fan_in)
    weight = jax.random.uniform(kw, (Cout, Cin, KH, KW), jnp.float32, -bound, bound)
    bias = jax.random.uniform(kb, (Cout,), jnp.float32, -bound, bound)
    gamma = 1.0 + 0.1 * jax.random.normal(kg, (Cout,), jnp.float32)
    beta = 0.1 * jax.random.normal(kbt, (Cout,), jnp.float32)

    # tm=64 at this toy size -> multi-tile grids, exercising the cross-tile stats accumulation.
    out = group3_forward(x, weight, bias, gamma, beta, tm=64)
    out = jax.block_until_ready(out)

    ref = jax.block_until_ready(reference(x, weight, bias, gamma, beta))
    assert out.shape == (N, Cout, H // 2, W // 2), out.shape
    np.testing.assert_allclose(np.asarray(out), np.asarray(ref), atol=5e-4, rtol=5e-4)

    print("KERNEL_OK")
</pallas_src>

<mosaic_0001>
module attributes {stable_mosaic.version = 11 : i64} {
  func.func @conv_stats_kernel(%arg0: i32, %arg1: memref<64x256xf32, #tpu.memory_space<vmem>>, %arg2: memref<64x32xf32, #tpu.memory_space<vmem>>, %arg3: memref<256x64xf32, #tpu.memory_space<vmem>>, %arg4: memref<32x64xf32, #tpu.memory_space<vmem>>, %arg5: memref<64x64xf32, #tpu.memory_space<vmem>>, %arg6: memref<1x64xf32, #tpu.memory_space<vmem>>, %arg7: memref<1x64xf32, #tpu.memory_space<vmem>>, %arg8: memref<1x64xf32, #tpu.memory_space<vmem>>, %arg9: memref<1x64xf32, #tpu.memory_space<vmem>>) attributes {dimension_semantics = [#tpu.dimension_semantics<arbitrary>], iteration_bounds = array<i64: 2>, scalar_prefetch = 0 : i64, scratch_operands = 2 : i64, tpu.core_type = #tpu.core_type<tc>, window_params = [{transform_indices = @transform_0, window_bounds = array<i64: 64, 256>}, {transform_indices = @transform_1, window_bounds = array<i64: 64, 32>}, {pipeline_mode = #tpu.pipeline_mode<synchronous>, transform_indices = @transform_2, window_bounds = array<i64: 256, 64>}, {pipeline_mode = #tpu.pipeline_mode<synchronous>, transform_indices = @transform_3, window_bounds = array<i64: 32, 64>}, {transform_indices = @transform_4, window_bounds = array<i64: 64, 64>}, {pipeline_mode = #tpu.pipeline_mode<synchronous>, transform_indices = @transform_5, window_bounds = array<i64: 1, 64>}, {pipeline_mode = #tpu.pipeline_mode<synchronous>, transform_indices = @transform_6, window_bounds = array<i64: 1, 64>}]} {
    %c0 = arith.constant 0 : index
    %c0_0 = arith.constant 0 : index
    %0 = vector.load %arg1[%c0, %c0_0] : memref<64x256xf32, #tpu.memory_space<vmem>>, vector<64x256xf32>
    %c0_1 = arith.constant 0 : index
    %c0_2 = arith.constant 0 : index
    %1 = vector.load %arg3[%c0_1, %c0_2] : memref<256x64xf32, #tpu.memory_space<vmem>>, vector<256x64xf32>
    %cst = arith.constant dense<0.000000e+00> : vector<64x64xf32>
    %2 = tpu.matmul %0, %1, %cst {dimension_numbers = #tpu.dot_dimension_numbers<[1], [0], [0], [1], [0, 0, 1, 1], [], []>} : vector<64x256xf32>, vector<256x64xf32>, vector<64x64xf32> -> vector<64x64xf32>
    %c0_3 = arith.constant 0 : index
    %c0_4 = arith.constant 0 : index
    %3 = vector.load %arg2[%c0_3, %c0_4] : memref<64x32xf32, #tpu.memory_space<vmem>>, vector<64x32xf32>
    %c0_5 = arith.constant 0 : index
    %c0_6 = arith.constant 0 : index
    %4 = vector.load %arg4[%c0_5, %c0_6] : memref<32x64xf32, #tpu.memory_space<vmem>>, vector<32x64xf32>
    %cst_7 = arith.constant dense<0.000000e+00> : vector<64x64xf32>
    %5 = tpu.matmul %3, %4, %cst_7 {dimension_numbers = #tpu.dot_dimension_numbers<[1], [0], [0], [1], [0, 0, 1, 1], [], []>} : vector<64x32xf32>, vector<32x64xf32>, vector<64x64xf32> -> vector<64x64xf32>
    %6 = arith.addf %2, %5 : vector<64x64xf32>
    %c0_8 = arith.constant 0 : index
    %c0_9 = arith.constant 0 : index
    %7 = vector.load %arg5[%c0_8, %c0_9] : memref<64x64xf32, #tpu.memory_space<vmem>>, vector<64x64xf32>
    tpu.vector_store %arg5[%c0_8, %c0_9], %6 {strides = array<i32>} : memref<64x64xf32, #tpu.memory_space<vmem>>, vector<64x64xf32>,
    %c0_i32 = arith.constant 0 : i32
    %8 = arith.cmpi eq, %arg0, %c0_i32 : i32
    %9 = arith.extui %8 : i1 to i32
    %c0_i32_10 = arith.constant 0 : i32
    %10 = arith.cmpi ne, %9, %c0_i32_10 : i32
    scf.if %10 {
      %cst_22 = arith.constant 0.000000e+00 : f32
      %25 = vector.broadcast %cst_22 : f32 to vector<1x64xf32>
      %c0_23 = arith.constant 0 : index
      %c0_24 = arith.constant 0 : index
      %26 = vector.load %arg8[%c0_23, %c0_24] : memref<1x64xf32, #tpu.memory_space<vmem>>, vector<1x64xf32>
      tpu.vector_store %arg8[%c0_23, %c0_24], %25 {strides = array<i32>} : memref<1x64xf32, #tpu.memory_space<vmem>>, vector<1x64xf32>,
      %cst_25 = arith.constant 0.000000e+00 : f32
      %27 = vector.broadcast %cst_25 : f32 to vector<1x64xf32>
      %c0_26 = arith.constant 0 : index
      %c0_27 = arith.constant 0 : index
      %28 = vector.load %arg9[%c0_26, %c0_27] : memref<1x64xf32, #tpu.memory_space<vmem>>, vector<1x64xf32>
      tpu.vector_store %arg9[%c0_26, %c0_27], %27 {strides = array<i32>} : memref<1x64xf32, #tpu.memory_space<vmem>>, vector<1x64xf32>,
    } else {
    }
    %c0_11 = arith.constant 0 : index
    %c0_12 = arith.constant 0 : index
    %11 = vector.load %arg8[%c0_11, %c0_12] : memref<1x64xf32, #tpu.memory_space<vmem>>, vector<1x64xf32>
    %cst_13 = arith.constant dense<0.000000e+00> : vector<64xf32>
    %12 = vector.multi_reduction <add>, %6, %cst_13 [0] : vector<64x64xf32> to vector<64xf32>
    %13 = vector.shape_cast %12 : vector<64xf32> to vector<1x64xf32>
    %14 = arith.addf %11, %13 : vector<1x64xf32>
    %c0_14 = arith.constant 0 : index
    %c0_15 = arith.constant 0 : index
    %15 = vector.load %arg8[%c0_14, %c0_15] : memref<1x64xf32, #tpu.memory_space<vmem>>, vector<1x64xf32>
    tpu.vector_store %arg8[%c0_14, %c0_15], %14 {strides = array<i32>} : memref<1x64xf32, #tpu.memory_space<vmem>>, vector<1x64xf32>,
    %c0_16 = arith.constant 0 : index
    %c0_17 = arith.constant 0 : index
    %16 = vector.load %arg9[%c0_16, %c0_17] : memref<1x64xf32, #tpu.memory_space<vmem>>, vector<1x64xf32>
    %17 = arith.mulf %6, %6 : vector<64x64xf32>
    %cst_18 = arith.constant dense<0.000000e+00> : vector<64xf32>
    %18 = vector.multi_reduction <add>, %17, %cst_18 [0] : vector<64x64xf32> to vector<64xf32>
    %19 = vector.shape_cast %18 : vector<64xf32> to vector<1x64xf32>
    %20 = arith.addf %16, %19 : vector<1x64xf32>
    %c0_19 = arith.constant 0 : index
    %c0_20 = arith.constant 0 : index
    %21 = vector.load %arg9[%c0_19, %c0_20] : memref<1x64xf32, #tpu.memory_space<vmem>>, vector<1x64xf32>
    tpu.vector_store %arg9[%c0_19, %c0_20], %20 {strides = array<i32>} : memref<1x64xf32, #tpu.memory_space<vmem>>, vector<1x64xf32>,
    %c1_i32 = arith.constant 1 : i32
    %22 = arith.cmpi eq, %arg0, %c1_i32 : i32
    %23 = arith.extui %22 : i1 to i32
    %c0_i32_21 = arith.constant 0 : i32
    %24 = arith.cmpi ne, %23, %c0_i32_21 : i32
    scf.if %24 {
      %c0_22 = arith.constant 0 : index
      %c0_23 = arith.constant 0 : index
      %25 = vector.load %arg8[%c0_22, %c0_23] : memref<1x64xf32, #tpu.memory_space<vmem>>, vector<1x64xf32>
      %c0_24 = arith.constant 0 : index
      %c0_25 = arith.constant 0 : index
      %26 = vector.load %arg6[%c0_24, %c0_25] : memref<1x64xf32, #tpu.memory_space<vmem>>, vector<1x64xf32>
      tpu.vector_store %arg6[%c0_24, %c0_25], %25 {strides = array<i32>} : memref<1x64xf32, #tpu.memory_space<vmem>>, vector<1x64xf32>,
      %c0_26 = arith.constant 0 : index
      %c0_27 = arith.constant 0 : index
      %27 = vector.load %arg9[%c0_26, %c0_27] : memref<1x64xf32, #tpu.memory_space<vmem>>, vector<1x64xf32>
      %c0_28 = arith.constant 0 : index
      %c0_29 = arith.constant 0 : index
      %28 = vector.load %arg7[%c0_28, %c0_29] : memref<1x64xf32, #tpu.memory_space<vmem>>, vector<1x64xf32>
      tpu.vector_store %arg7[%c0_28, %c0_29], %27 {strides = array<i32>} : memref<1x64xf32, #tpu.memory_space<vmem>>, vector<1x64xf32>,
    } else {
    }
    return
  }
  func.func @transform_0(%arg0: i32) -> (i32, i32) {
    %c0_i32 = arith.constant 0 : i32
    %c0_i32_0 = arith.constant 0 : i32
    return %arg0, %c0_i32 : i32, i32
  }
  func.func @transform_1(%arg0: i32) -> (i32, i32) {
    %c0_i32 = arith.constant 0 : i32
    %c0_i32_0 = arith.constant 0 : i32
    return %arg0, %c0_i32 : i32, i32
  }
  func.func @transform_2(%arg0: i32) -> (i32, i32) {
    %c0_i32 = arith.constant 0 : i32
    %c0_i32_0 = arith.constant 0 : i32
    %c0_i32_1 = arith.constant 0 : i32
    return %c0_i32, %c0_i32_0 : i32, i32
  }
  func.func @transform_3(%arg0: i32) -> (i32, i32) {
    %c0_i32 = arith.constant 0 : i32
    %c0_i32_0 = arith.constant 0 : i32
    %c0_i32_1 = arith.constant 0 : i32
    return %c0_i32, %c0_i32_0 : i32, i32
  }
  func.func @transform_4(%arg0: i32) -> (i32, i32) {
    %c0_i32 = arith.constant 0 : i32
    %c0_i32_0 = arith.constant 0 : i32
    return %arg0, %c0_i32 : i32, i32
  }
  func.func @transform_5(%arg0: i32) -> (i32, i32) {
    %c0_i32 = arith.constant 0 : i32
    %c0_i32_0 = arith.constant 0 : i32
    %c0_i32_1 = arith.constant 0 : i32
    return %c0_i32, %c0_i32_0 : i32, i32
  }
  func.func @transform_6(%arg0: i32) -> (i32, i32) {
    %c0_i32 = arith.constant 0 : i32
    %c0_i32_0 = arith.constant 0 : i32
    %c0_i32_1 = arith.constant 0 : i32
    return %c0_i32, %c0_i32_0 : i32, i32
  }
}

</mosaic_0001>

<bundles_post_ra>
// kernel: tpu_custom_call.1
= control target key start
LH: loop header
LB: loop body
LE: loop exit
PB: predicated region body
PF: predicated region fallthrough
CT: control target
= control target key end

     0   :  { %12 = vsyncpa [#allocation5], 0  ;;  %s1325_s0 = inlined_call_operand.vmem [shape: f32[128,256], index: 0, kind: input, shape index: {}]   ;;  %s1326_s1 = inlined_call_operand.vmem [shape: f32[128,32], index: 1, kind: input, shape index: {}]   ;;  %s1327_s2 = inlined_call_operand.vmem [shape: f32[256,64], index: 2, kind: input, shape index: {}]   ;;  %s1328_s3 = inlined_call_operand.vmem [shape: f32[32,64], index: 3, kind: input, shape index: {}]   ;;  %s1329_s4 = inlined_call_operand.vmem [shape: f32[128,64], index: 4, kind: output, shape index: {0}]   ;;  %s1330_s5 = inlined_call_operand.hbm [shape: f32[1,64], index: 5, kind: output, shape index: {1}]   ;;  %s1331_s6 = inlined_call_operand.hbm [shape: f32[1,64], index: 6, kind: output, shape index: {2}]  }
   0x1   :  { %13 = vsyncpa [#allocation7], 0  ;;  %s1069_s21 = smov 0  }
   0x2 LB: > { %s1075_s22 = sadd.s32 4294967295, %s1029_s21   ;;  %p771_p0 = scmp.ge.s32.totalorder %s1029_s21, 1  ;;  %s1029_s21 = sphi %s1069_s21, %s19_s21  }
   0x3   : > { %p222_p1 = scmp.lt.s32.totalorder %s1029_s21, 3 }
   0x5   : > { %p223_p2 = pnand %p771_p0, %p222_p1 }
   0x6   : > { %v333_v0 = vld [vmem:[%s1328_s3] sm:$0xff] (!%p223_p2)  ;;  %v334_v1 = vld [vmem:[%s1328_s3 + $0x8] sm:$0xff] (!%p223_p2)  ;;  %s772_s29 = sshll.u32 (!%p223_p2), %s1075_s22, 3  ;;  %v335_v9 = vld [vmem:[%s1328_s3 + $0x10] sm:$0xff] (!%p223_p2)  ;;  %vm337_vm0 = vcmask (!%p223_p2), 261120   ;;  %vm572_vm1 = vcmask (!%p223_p2), 523264  }
   0x7   : > { %226 = sbr.rel (%p223_p2) target bundleno = 366 (0x16e), region = 36  ;;  %v309_v2 = vld [vmem:[%s1327_s2 + $0x80] sm:$0xff] (!%p223_p2)  ;;  %v884_v3 = vpack.c.bf16 (!%p223_p2), %v334_v1, %v333_v0  ;;  %v310_v4 = vld [vmem:[%s1327_s2 + $0x88] sm:$0xff] (!%p223_p2)  ;;  %p259_p3 = scmp.lt.s32.totalorder (!%p223_p2), %s772_s29, 15  ;;  %v336_v10 = vld [vmem:[%s1328_s3 + $0x18] sm:$0xff] (!%p223_p2) }
   0x8   : > { %v293_v5 = vld [vmem:[%s1327_s2] sm:$0xff] (!%p223_p2)  ;;  %v294_v6 = vld [vmem:[%s1327_s2 + $0x8] sm:$0xff] (!%p223_p2)  ;;  %v892_v7 = vpack.c.bf16 (!%p223_p2), %v310_v4, %v309_v2  ;;  %v311_v11 = vld [vmem:[%s1327_s2 + $0x90] sm:$0xff] (!%p223_p2)  ;;  %v888_v12 = vpack.c.bf16 (!%p223_p2), %v336_v10, %v335_v9  ;;  %p787_p4 = scmp.ne.s32.totalorder (!%p223_p2), %s1075_s22, 0 }
   0x9   : > { %v894_v8 = vpack.c.bf16 (!%p223_p2), %v294_v6, %v293_v5  ;;  %885 = vmatprep.subr.bf16.mxu0 (!%p223_p2), %v884_v3  ;;  %v312_v13 = vld [vmem:[%s1327_s2 + $0x98] sm:$0xff] (!%p223_p2)  ;;  %v295_v14 = vld [vmem:[%s1327_s2 + $0x10] sm:$0xff] (!%p223_p2)  ;;  %v313_v17 = vld [vmem:[%s1327_s2 + $0xa0] sm:$0xff] (!%p223_p2) }
   0xa   : > { %v296_v15 = vld [vmem:[%s1327_s2 + $0x18] sm:$0xff] (!%p223_p2)  ;;  %924 = vmatprep.subr.bf16.mxu1 (!%p223_p2), %v892_v7  ;;  %887 = vmatpush3.bf16.msra.mxu0 (!%p223_p2), %v884_v3  ;;  %v896_v16 = vpack.c.bf16 (!%p223_p2), %v312_v13, %v311_v11  ;;  %v314_v18 = vld [vmem:[%s1327_s2 + $0xa8] sm:$0xff] (!%p223_p2)  ;;  %v297_v21 = vld [vmem:[%s1327_s2 + $0x20] sm:$0xff] (!%p223_p2) }
   0xb   : > { %932 = vmatpush3.bf16.msra.mxu1 (!%p223_p2), %v894_v8  ;;  %889 = vmatprep.subr.bf16.mxu0 (!%p223_p2), %v888_v12  ;;  %v898_v19 = vpack.c.bf16 (!%p223_p2), %v296_v15, %v295_v14  ;;  %v900_v20 = vpack.c.bf16 (!%p223_p2), %v314_v18, %v313_v17  ;;  %v298_v22 = vld [vmem:[%s1327_s2 + $0x28] sm:$0xff] (!%p223_p2)  ;;  %v315_v24 = vld [vmem:[%s1327_s2 + $0xb0] sm:$0xff] (!%p223_p2)  ;;  %v316_v25 = vld [vmem:[%s1327_s2 + $0xb8] sm:$0xff] (!%p223_p2) }
   0xc   : > { %925 = vmatprep.subr.bf16.mxu1 (!%p223_p2), %v896_v16  ;;  %v902_v27 = vpack.c.bf16 (!%p223_p2), %v298_v22, %v297_v21  ;;  %v904_v28 = vpack.c.bf16 (!%p223_p2), %v316_v25, %v315_v24  ;;  %v299_v29 = vld [vmem:[%s1327_s2 + $0x30] sm:$0xff] (!%p223_p2)  ;;  %v300_v30 = vld [vmem:[%s1327_s2 + $0x38] sm:$0xff] (!%p223_p2)  ;;  %v317_v31 = vld [vmem:[%s1327_s2 + $0xc0] sm:$0xff] (!%p223_p2) }
   0xd   : > { %v318_v32 = vld [vmem:[%s1327_s2 + $0xc8] sm:$0xff] (!%p223_p2)  ;;  %v906_v35 = vpack.c.bf16 (!%p223_p2), %v300_v30, %v299_v29  ;;  %v301_v38 = vld [vmem:[%s1327_s2 + $0x40] sm:$0xff] (!%p223_p2)  ;;  %v319_v41 = vld [vmem:[%s1327_s2 + $0xd0] sm:$0xff] (!%p223_p2) }
   0xe   : > { %s1333_s29 = smov (!%p259_p3, %s772_s29), 15  ;;  %891 = vmatpush3.bf16.msra.mxu0 %v888_v12  ;;  %v908_v37 = vpack.c.bf16 %v318_v32, %v317_v31  ;;  %v302_v39 = vld [vmem:[%s1327_s2 + $0x48] sm:$0xff]  ;;  %v320_v42 = vld [vmem:[%s1327_s2 + $0xd8] sm:$0xff]  ;;  %v303_v47 = vld [vmem:[%s1327_s2 + $0x50] sm:$0xff]  ;;  %vm585_vm2 = vcmask (!%p787_p4), 516096  }
   0xf   : > { %s776_s7 = sshll.u32 %s1333_s29, 3  ;;  %s795_s19 = sshll.u32 %s1333_s29, 4  ;;  %933 = vmatpush3.bf16.msra.mxu1 %v898_v19  ;;  %893 = vmatprep.subr.bf16.mxu0 %v892_v7  ;;  %v910_v44 = vpack.c.bf16 %v302_v39, %v301_v38  ;;  %v912_v46 = vpack.c.bf16 %v320_v42, %v319_v41  ;;  %v304_v48 = vld [vmem:[%s1327_s2 + $0x58] sm:$0xff]  ;;  %v321_v49 = vld [vmem:[%s1327_s2 + $0xe0] sm:$0xff]  ;;  %v322_v50 = vld [vmem:[%s1327_s2 + $0xe8] sm:$0xff] }
  0x10   : > { %s1130_s10 = scalar_lea.vmem %s1326_s1, %s776_s7  ;;  %926 = vmatprep.subr.bf16.mxu1 %v900_v20  ;;  %s1157_s28 = scalar_lea.vmem %s1325_s0, %s795_s19  ;;  %v914_v52 = vpack.c.bf16 %v304_v48, %v303_v47  ;;  %v916_v54 = vpack.c.bf16 %v322_v50, %v321_v49  ;;  %v305_v55 = vld [vmem:[%s1327_s2 + $0x60] sm:$0xff]  ;;  %v306_v56 = vld [vmem:[%s1327_s2 + $0x68] sm:$0xff]  ;;  %v323_v57 = vld [vmem:[%s1327_s2 + $0xf0] sm:$0xff] }
  0x11   : > { %v325_v23 = vld [vmem:[%s1130_s10] sm:$0xff]  ;;  %v326_v26 = vld [vmem:[%s1130_s10 + $0x8] sm:$0xff]  ;;  %v327_v33 = vld [vmem:[%s1130_s10 + $0x10] sm:$0xff]  ;;  %v918_v59 = vpack.c.bf16 %v306_v56, %v305_v55  ;;  %s1241_s25 = scalar_lea.vmem %s1329_s4, %s776_s7 }
  0x12   : > { %872 = vmatprep.mubr.msk.f32.mxu0 %vm337_vm0, %v325_v23  ;;  %v328_v34 = vld [vmem:[%s1130_s10 + $0x18] sm:$0xff]  ;;  %v329_v36 = vld [vmem:[%s1130_s10 + $0x20] sm:$0xff]  ;;  %v330_v43 = vld [vmem:[%s1130_s10 + $0x28] sm:$0xff] }
  0x13   : > { %873 = vmatmul.mubr.msk.f32.vlgmr.msra.gmra.mrb[0].mxu0 %vm337_vm0, %v326_v26  ;;  %934 = vmatpush3.bf16.msra.mxu1 %v902_v27  ;;  %v284_v40 = vld [vmem:[%s1157_s28 + $0x38] sm:$0xff]  ;;  %v331_v45 = vld [vmem:[%s1130_s10 + $0x30] sm:$0xff]  ;;  %v278_v53 = vld [vmem:[%s1157_s28 + $0x8] sm:$0xff] }
  0x14   : > { %895 = vmatpush3.bf16.msra.mxu0 %v894_v8  ;;  %875 = vmatprep.mubr.msk.f32.mxu0 %vm337_vm0, %v327_v33  ;;  %v332_v51 = vld [vmem:[%s1130_s10 + $0x38] sm:$0xff]  ;;  %v307_v61 = vld [vmem:[%s1327_s2 + $0x70] sm:$0xff]  ;;  %v286_v1 = vld [vmem:[%s1157_s28 + $0x48] sm:$0xff] }
  0x15   : > { %897 = vmatprep.subr.bf16.mxu0 %v896_v16  ;;  %927 = vmatprep.subr.bf16.mxu1 %v904_v28  ;;  %v324_v58 = vld [vmem:[%s1327_s2 + $0xf8] sm:$0xff]  ;;  %v283_v0 = vld [vmem:[%s1157_s28 + $0x30] sm:$0xff]  ;;  %v285_v2 = vld [vmem:[%s1157_s28 + $0x40] sm:$0xff] }
  0x16   : > { %546 = vmatprep.mubr.f32.mxu1 %v284_v40  ;;  %v920_v60 = vpack.c.bf16 %v324_v58, %v323_v57  ;;  %v308_v62 = vld [vmem:[%s1327_s2 + $0x78] sm:$0xff]  ;;  %v277_v4 = vld [vmem:[%s1157_s28] sm:$0xff]  ;;  %v287_v5 = vld [vmem:[%s1157_s28 + $0x50] sm:$0xff] }
  0x17   : > { %876 = vmatmul.mubr.msk.f32.gmra.mrb[2].mxu0 %vm337_vm0, %v328_v34  ;;  %935 = vmatpush3.bf16.msra.mxu1 %v906_v35  ;;  %v922_v63 = vpack.c.bf16 %v308_v62, %v307_v61  ;;  %v288_v3 = vld [vmem:[%s1157_s28 + $0x58] sm:$0xff]  ;;  %v290_v7 = vld [vmem:[%s1157_s28 + $0x68] sm:$0xff]  ;;  %v279_v8 = vld [vmem:[%s1157_s28 + $0x10] sm:$0xff] }
  0x18   : > { %899 = vmatpush3.bf16.msra.mxu0 %v898_v19  ;;  %878 = vmatprep.mubr.msk.f32.mxu0 %vm337_vm0, %v329_v36  ;;  %v280_v6 = vld [vmem:[%s1157_s28 + $0x18] sm:$0xff]  ;;  %v289_v9 = vld [vmem:[%s1157_s28 + $0x60] sm:$0xff]  ;;  %v282_v10 = vld [vmem:[%s1157_s28 + $0x28] sm:$0xff] }
  0x19   : > { %901 = vmatprep.subr.bf16.mxu0 %v900_v20  ;;  %928 = vmatprep.subr.bf16.mxu1 %v908_v37  ;;  %v292_v11 = vld [vmem:[%s1157_s28 + $0x78] sm:$0xff]  ;;  %v281_v12 = vld [vmem:[%s1157_s28 + $0x20] sm:$0xff]  ;;  %v291_v13 = vld [vmem:[%s1157_s28 + $0x70] sm:$0xff] }
  0x1b   : > { %879 = vmatmul.mubr.msk.f32.gmra.mrb[4].mxu0 %vm337_vm0, %v330_v43  ;;  %936 = vmatpush3.bf16.msra.mxu1 %v910_v44 }
  0x1c   : > { %903 = vmatpush3.bf16.msra.mxu0 %v902_v27  ;;  %881 = vmatprep.mubr.msk.f32.mxu0 %vm337_vm0, %v331_v45 }
  0x1d   : > { %905 = vmatprep.subr.bf16.mxu0 %v904_v28  ;;  %929 = vmatprep.subr.bf16.mxu1 %v912_v46 }
  0x1f   : > { %882 = vmatmul.mubr.msk.f32.gmra.mrb[6].mxu0 %vm337_vm0, %v332_v51  ;;  %937 = vmatpush3.bf16.msra.mxu1 %v914_v52 }
  0x20   : > { %907 = vmatpush3.bf16.msra.mxu0 %v906_v35  ;;  %531 = vmatprep.mubr.f32.mxu0 %v278_v53 }
  0x21   : > { %909 = vmatprep.subr.bf16.mxu0 %v908_v37  ;;  %930 = vmatprep.subr.bf16.mxu1 %v916_v54 }
  0x23   : > { %938 = vmatpush3.bf16.msra.mxu1 %v918_v59 }
  0x24   : > { %911 = vmatpush3.bf16.msra.mxu0 %v910_v44  ;;  %931 = vmatprep.subr.bf16.mxu1 %v920_v60 }
  0x25   : > { %913 = vmatprep.subr.bf16.mxu0 %v912_v46 }
  0x27   : > { %939 = vmatpush3.bf16.msra.mxu1 %v922_v63 }
  0x28   : > { %915 = vmatpush3.bf16.msra.mxu0 %v914_v52 }
  0x29   : > { %917 = vmatprep.subr.bf16.mxu0 %v916_v54  ;;  %v1031_v54 = vmov (!%p787_p4), 0.0  }
  0x2a   : > { %547 = vmatmul.mubr.f32.vlgmr.msra.gmra.mrb[0].mxu1 %v283_v0  ;;  %586 = vst.msk [vmem:[#allocation2] sm:$0x1] (!%p787_p4), %vm585_vm2, %v1031_v54  ;;  %587 = vst.msk [vmem:[#allocation3] sm:$0x1] (!%p787_p4), %vm585_vm2, %v1031_v54 }
  0x2b   : > { %551 = vmatprep.mubr.f32.mxu1 %v286_v1 }
  0x2c   : > { %919 = vmatpush3.bf16.msra.mxu0 %v918_v59 }
  0x2d   : > { %921 = vmatprep.subr.bf16.mxu0 %v920_v60 }
  0x2e   : > { %552 = vmatmul.mubr.f32.gmra.mrb[2].mxu1 %v285_v2 }
  0x2f   : > { %556 = vmatprep.mubr.f32.mxu1 %v288_v3 }
  0x30   : > { %923 = vmatpush3.bf16.msra.mxu0 %v922_v63 }
  0x32   : > { %557 = vmatmul.mubr.f32.gmra.mrb[4].mxu1 %v287_v5 }
  0x33   : > { %532 = vmatmul.mubr.f32.vlgmr.msra.gmra.mrb[8].mxu0 %v277_v4  ;;  %561 = vmatprep.mubr.f32.mxu1 %v290_v7 }
  0x34   : > { %536 = vmatprep.mubr.f32.mxu0 %v280_v6 }
  0x36   : > { %562 = vmatmul.mubr.f32.gmra.mrb[6].mxu1 %v289_v9 }
  0x37   : > { %537 = vmatmul.mubr.f32.gmra.mrb[10].mxu0 %v279_v8  ;;  %566 = vmatprep.mubr.f32.mxu1 %v292_v11 }
  0x38   : > { %541 = vmatprep.mubr.f32.mxu0 %v282_v10 }
  0x3a   : > { %567 = vmatmul.mubr.f32.gmra.mrb[8].mxu1 %v291_v13 }
  0x3b   : > { %542 = vmatmul.mubr.f32.gmra.mrb[12].mxu0 %v281_v12 }
  0xe6   : > { %v874_v14 = vpop.f32.mrb[0].mxu0 }
  0xe7   : > { %v428_v15 = vpop.f32.mrb[1].mxu0 }
  0xea   : > { %v877_v16 = vpop.f32.mrb[2].mxu0 }
  0xeb   : > { %v438_v17 = vpop.f32.mrb[3].mxu0 }
  0xee   : > { %v880_v18 = vpop.f32.mrb[4].mxu0 }
  0xef   : > { %v448_v19 = vpop.f32.mrb[5].mxu0 }
  0xf2   : > { %v883_v20 = vpop.f32.mrb[6].mxu0 }
  0xf3   : > { %v458_v21 = vpop.f32.mrb[7].mxu0 }
  0xfd   : > { %v849_v22 = vpop.f32.mrb[0].mxu1 }
  0xfe   : > { %v850_v23 = vpop.f32.mrb[1].mxu1 }
  0xff   : > { %v851_v24 = vadd.f32 %v850_v23, %v849_v22 }
 0x101   : > { %v549_v25 = vadd.f32 %v877_v16, %v851_v24  ;;  %v852_v26 = vpop.f32.mrb[2].mxu1 }
 0x102   : > { %v853_v27 = vpop.f32.mrb[3].mxu1 }
 0x103   : > { %576 = vst.msk [vmem:[%s1241_s25 + $0x18] sm:$0xff] %vm572_vm1, %v549_v25  ;;  %v854_v28 = vadd.f32 %v853_v27, %v852_v26 }
 0x105   : > { %v554_v30 = vadd.f32 %v854_v28, %v448_v19  ;;  %v855_v31 = vpop.f32.mrb[4].mxu1 }
 0x106   : > { %v840_v29 = vpop.f32.mrb[8].mxu0  ;;  %v856_v34 = vpop.f32.mrb[5].mxu1 }
 0x107   : > { %v841_v32 = vpop.f32.mrb[9].mxu0  ;;  %577 = vst.msk [vmem:[%s1241_s25 + $0x20] sm:$0xff] %vm572_vm1, %v554_v30  ;;  %v857_v35 = vadd.f32 %v856_v34, %v855_v31 }
 0x108   : > { %v842_v33 = vadd.f32 %v841_v32, %v840_v29 }
 0x109   : > { %v559_v38 = vadd.f32 %v880_v18, %v857_v35  ;;  %v858_v39 = vpop.f32.mrb[6].mxu1 }
 0x10a   : > { %v534_v36 = vadd.f32 %v842_v33, %v428_v15  ;;  %v843_v37 = vpop.f32.mrb[10].mxu0  ;;  %v859_v42 = vpop.f32.mrb[7].mxu1 }
 0x10b   : > { %v844_v40 = vpop.f32.mrb[11].mxu0  ;;  %578 = vst.msk [vmem:[%s1241_s25 + $0x28] sm:$0xff] %vm572_vm1, %v559_v38  ;;  %v860_v43 = vadd.f32 %v859_v42, %v858_v39 }
 0x10c   : > { %573 = vst.msk [vmem:[%s1241_s25] sm:$0xff] %vm572_vm1, %v534_v36  ;;  %v845_v41 = vadd.f32 %v844_v40, %v843_v37 }
 0x10d   : > { %v564_v46 = vadd.f32 %v860_v43, %v458_v21  ;;  %v861_v47 = vpop.f32.mrb[8].mxu1 }
 0x10e   : > { %v539_v44 = vadd.f32 %v874_v14, %v845_v41  ;;  %v846_v45 = vpop.f32.mrb[12].mxu0  ;;  %v862_v50 = vpop.f32.mrb[9].mxu1  ;;  %584 = sbr.rel (%p787_p4) target bundleno = 277 (0x115), region = 40 }
 0x10f   : > { %v847_v48 = vpop.f32.mrb[13].mxu0  ;;  %579 = vst.msk [vmem:[%s1241_s25 + $0x30] sm:$0xff] %vm572_vm1, %v564_v46  ;;  %v863_v51 = vadd.f32 %v862_v50, %v861_v47 }
 0x110   : > { %574 = vst.msk [vmem:[%s1241_s25 + $0x8] sm:$0xff] %vm572_vm1, %v539_v44  ;;  %v848_v49 = vadd.f32 %v847_v48, %v846_v45 }
 0x111   : > { %v569_v53 = vadd.f32 %v883_v20, %v863_v51 }
 0x112   : > { %v544_v52 = vadd.f32 %v848_v49, %v438_v17 }
 0x113   : > { %580 = vst.msk [vmem:[%s1241_s25 + $0x38] sm:$0xff] %vm572_vm1, %v569_v53 }
 0x114   : > { %575 = vst.msk [vmem:[%s1241_s25 + $0x10] sm:$0xff] %vm572_vm1, %v544_v52 }
 0x115 PF: > { %v589_v55 = vsel %vm572_vm1, %v534_v36, 0.0  ;;  %v590_v56 = vsel %vm572_vm1, %v539_v44, 0.0  ;;  %v592_v57 = vsel %vm572_vm1, %v544_v52, 0.0  ;;  %v594_v59 = vsel %vm572_vm1, %v549_v25, 0.0  ;;  %v613_v42 = vld [vmem:[#allocation3] sm:$0x1] }
 0x116   : > { %v591_v58 = vadd.f32 %v590_v56, %v589_v55  ;;  %v614_v60 = vmul.f32 %v534_v36, %v534_v36  ;;  %v615_v61 = vmul.f32 %v539_v44, %v539_v44  ;;  %v616_v63 = vmul.f32 %v544_v52, %v544_v52  ;;  %v588_v36 = vld [vmem:[#allocation2] sm:$0x1]  ;;  %p788_p5 = scmp.ne.s32.totalorder %s1075_s22, 1 }
 0x117   : > { %v617_v0 = vmul.f32 %v549_v25, %v549_v25  ;;  %v596_v1 = vsel %vm572_vm1, %v554_v30, 0.0  ;;  %v618_v4 = vmul.f32 %v554_v30, %v554_v30  ;;  %v598_v7 = vsel %vm572_vm1, %v559_v38, 0.0 }
 0x118   : > { %v593_v62 = vadd.f32 %v592_v57, %v591_v58  ;;  %v622_v2 = vsel %vm572_vm1, %v614_v60, 0.0  ;;  %v623_v5 = vsel %vm572_vm1, %v615_v61, 0.0  ;;  %v625_v6 = vsel %vm572_vm1, %v616_v63, 0.0 }
 0x119   : > { %v624_v8 = vadd.f32 %v623_v5, %v622_v2  ;;  %v619_v10 = vmul.f32 %v559_v38, %v559_v38  ;;  %v627_v11 = vsel %vm572_vm1, %v617_v0, 0.0  ;;  %v600_v12 = vsel %vm572_vm1, %v564_v46, 0.0 }
 0x11a   : > { %v595_v3 = vadd.f32 %v594_v59, %v593_v62  ;;  %v620_v15 = vmul.f32 %v564_v46, %v564_v46  ;;  %v629_v16 = vsel %vm572_vm1, %v618_v4, 0.0  ;;  %v602_v17 = vsel %vm572_vm1, %v569_v53, 0.0 }
 0x11b   : > { %v626_v13 = vadd.f32 %v625_v6, %v624_v8  ;;  %v621_v20 = vmul.f32 %v569_v53, %v569_v53  ;;  %v631_v21 = vsel %vm572_vm1, %v619_v10, 0.0  ;;  %vm611_vm3 = vcmask 516096  }
 0x11c   : > { %v597_v9 = vadd.f32 %v596_v1, %v595_v3  ;;  %v633_v24 = vsel %vm572_vm1, %v620_v15, 0.0 }
 0x11d   : > { %v628_v18 = vadd.f32 %v627_v11, %v626_v13  ;;  %v635_v27 = vsel %vm572_vm1, %v621_v20, 0.0 }
 0x11e   : > { %v599_v14 = vadd.f32 %v598_v7, %v597_v9 }
 0x11f   : > { %v630_v22 = vadd.f32 %v629_v16, %v628_v18 }
 0x120   : > { %v601_v19 = vadd.f32 %v600_v12, %v599_v14 }
 0x121   : > { %v632_v25 = vadd.f32 %v631_v21, %v630_v22 }
 0x122   : > { %v603_v23 = vadd.f32 %v602_v17, %v601_v19 }
 0x123   : > { %v634_v28 = vadd.f32 %v633_v24, %v632_v25 }
 0x124   : > { %v604_v26 = vrot.slane %v603_v23, 4 }
 0x125   : > { %v636_v30 = vadd.f32 %v635_v27, %v634_v28 }
 0x126   : > { %v605_v29 = vadd.f32 %v604_v26, %v603_v23 }
 0x127   : > { %v637_v32 = vrot.slane %v636_v30, 4 }
 0x128   : > { %v606_v31 = vrot.slane %v605_v29, 2 }
 0x129   : > { %v638_v34 = vadd.f32 %v637_v32, %v636_v30 }
 0x12a   : > { %v607_v33 = vadd.f32 %v606_v31, %v605_v29 }
 0x12b   : > { %v639_v37 = vrot.slane %v638_v34, 2 }
 0x12c   : > { %v608_v35 = vrot.slane %v607_v33, 1 }
 0x12d   : > { %v640_v39 = vadd.f32 %v639_v37, %v638_v34 }
 0x12e   : > { %v609_v38 = vadd.f32 %v608_v35, %v607_v33 }
 0x12f   : > { %v641_v41 = vrot.slane %v640_v39, 1  ;;  %648 = sbr.rel (%p788_p5) target bundleno = 318 (0x13e), region = 44 }
 0x130   : > { %v610_v40 = vadd.f32 %v609_v38, %v588_v36 }
 0x131   : > { %v642_v43 = vadd.f32 %v641_v41, %v640_v39 }
 0x132   : > { %612 = vst.msk [vmem:[#allocation2] sm:$0x1] %vm611_vm3, %v610_v40 }
 0x133   : > { %v643_v44 = vadd.f32 %v642_v43, %v613_v42 }
 0x135   : > { %644 = vst.msk [vmem:[#allocation3] sm:$0x1] %vm611_vm3, %v643_v44 }
 0x139   : > { %v649_v45 = vld [vmem:[#allocation2] sm:$0x1] }
 0x13a   : > { %650 = vst.msk [vmem:[#allocation4] sm:$0x1] %vm611_vm3, %v649_v45 }
 0x13c   : > { %v651_v46 = vld [vmem:[#allocation3] sm:$0x1] }
 0x13d   : > { %652 = vst.msk [vmem:[#allocation6] sm:$0x1] %vm611_vm3, %v651_v46 }
 0x13e PF: > { %p948_p6 = scmp.eq.s32.totalorder %s1075_s22, 1  ;;  %s1032_s29 = smov [#allocation4]  }
 0x13f   : > { %s669_s7 = sshll.u32 %s1032_s29, 4  ;;  %s1033_s28 = smov [#allocation6]   ;;  %s670_s7 = int_to_ptr.vmem [resolvable:$true] %s669_s7 }
 0x140   : > { %s680_s26 = sshll.u32 %s1033_s28, 4  ;;  %s963_s27 = scalar_lea.vmem %s670_s7, 16  ;;  %s681_s26 = int_to_ptr.vmem [resolvable:$true] %s680_s26 }
 0x141   : > { %p964_p7 = scmp.ne.s32.totalorder %s670_s7, %s963_s27  ;;  %s969_s30 = scalar_lea.vmem %s670_s7, 32 }
 0x142   : > { %p970_p10 = scmp.lt.s32.totalorder %s670_s7, %s670_s7  ;;  %p971_p11 = scmp.lt.s32.totalorder %s969_s30, %s963_s27 }
 0x143   : > { %p965_p8 = pnand %p964_p7, %p948_p6 }
 0x144   : > { %p972_p12 = por %p971_p11, %p970_p10 }
 0x145   : > { %p966_p9 = pneg %p965_p8 }
 0x147   : > { %p973_p13 = pnand %p972_p12, %p966_p9 }
 0x149   : > { %976 = shalt.err (!%p973_p13)
}
 0x14a   : > { %s977_s11 = scalar_lea.hbm %s1330_s5, 16 }
 0x14b   : > { %p978_p0 = scmp.ne.s32.totalorder %s1330_s5, %s977_s11  ;;  %p983_p3 = scmp.lt.u32.totalorder %s977_s11, %s1330_s5 }
 0x14d   : > { %p979_p1 = pnand %p978_p0, %p948_p6 }
 0x14f   : > { %p980_p2 = pneg %p979_p1 }
 0x151   : > { %p985_p4 = pnand %p983_p3, %p980_p2 }
 0x153   : > { %988 = shalt.err (!%p985_p4)
}
 0x154   : > { %941 = dma.vmem_to_hbm [thread:$0]  (%p948_p6), %s670_s7, 16, %s1330_s5, [#allocation5]  }
 0x155   : > { %s989_s17 = scalar_lea.vmem %s681_s26, 16  ;;  %s995_s18 = scalar_lea.vmem %s681_s26, 32 }
 0x156   : > { %p990_p5 = scmp.ne.s32.totalorder %s681_s26, %s989_s17  ;;  %p996_p9 = scmp.lt.s32.totalorder %s681_s26, %s681_s26 }
 0x157   : > { %p997_p10 = scmp.lt.s32.totalorder %s995_s18, %s989_s17 }
 0x158   : > { %p991_p7 = pnand %p990_p5, %p948_p6 }
 0x159   : > { %p998_p11 = por %p997_p10, %p996_p9 }
 0x15a   : > { %p992_p8 = pneg %p991_p7 }
 0x15c   : > { %p999_p12 = pnand %p998_p11, %p992_p8 }
 0x15e   : > { %1002 = shalt.err (!%p999_p12)
}
 0x15f   : > { %s1003_s23 = scalar_lea.hbm %s1331_s6, 16 }
 0x160   : > { %p1004_p13 = scmp.ne.s32.totalorder %s1331_s6, %s1003_s23  ;;  %p1009_p2 = scmp.lt.u32.totalorder %s1003_s23, %s1331_s6 }
 0x162   : > { %p1005_p0 = pnand %p1004_p13, %p948_p6 }
 0x164   : > { %p1006_p1 = pneg %p1005_p0 }
 0x166   : > { %p1011_p3 = pnand %p1009_p2, %p1006_p1 }
 0x168   : > { %1014 = shalt.err (!%p1011_p3)
}
 0x169   : > { %943 = dma.vmem_to_hbm [thread:$0]  (%p948_p6), %s681_s26, 16, %s1331_s6, [#allocation7]  }
 0x16a   : > { %1020 = dma.done.wait (%p948_p6), [#allocation5], 16  }
 0x16b   : > { %1022 = vsyncadd (%p948_p6), [#allocation5], 4294967280 }
 0x16c   : > { %1024 = dma.done.wait (%p948_p6), [#allocation7], 16  }
 0x16d   : > { %1026 = vsyncadd (%p948_p6), [#allocation7], 4294967280 }
 0x16e PF: > { %s19_s21 = sadd.s32 1, %s1029_s21  }
 0x16f   : > { %p16_p4 = scmp.ge.s32.totalorder %s19_s21, 4  }
 0x171   :  { %18 = sbr.rel (!%p16_p4) target bundleno = 2 (0x2), region = 94 }
 0x178   :  { %705 = vsyncpa [#allocation5], 1 }
 0x179   :  { %707 = vsyncpa [#allocation5 + $0x1], 1 }
 0x17a   :  { %708 = vsyncpa [#allocation7], 1 }

</bundles_post_ra>
